<compile_context>
chip_gen: v7x
topology: tpu7x:2x2x1
jax: 0.10.0
libtpu: 0.0.40
codegen_flags: <defaults>
</compile_context>

<pallas_src>
import math

import jax
import jax.numpy as jnp
from jax.experimental import pallas as pl
from jax.experimental.pallas import tpu as pltpu


def time_embedding_kernel(t_ref, freqs_ref, w0c_ref, w0s_ref, b0_ref,
                          w1_ref, b1_ref, out_ref):
    """Fused sinusoidal-embed -> linear_0 -> SiLU -> linear_1 on one row tile."""
    t = t_ref[...]                          # (tm, 1)   f32
    freqs = freqs_ref[...]                  # (1, half) f32
    args = t * freqs                        # (tm, half) outer product

    # First linear as two accumulating K=half matmuls (no lane-axis concat).
    cos_e = jnp.cos(args).astype(w0c_ref.dtype)
    sin_e = jnp.sin(args).astype(w0s_ref.dtype)
    h = (jnp.dot(cos_e, w0c_ref[...], preferred_element_type=jnp.float32)
         + jnp.dot(sin_e, w0s_ref[...], preferred_element_type=jnp.float32)
         + b0_ref[...])                     # (tm, C_time) f32

    # SiLU: x * sigmoid(x).  exp + approximate reciprocal both run on the EUP.
    h = h * pl.reciprocal(1.0 + jnp.exp(-h), approx=True)

    out = jnp.dot(h.astype(w1_ref.dtype), w1_ref[...],
                  preferred_element_type=jnp.float32) + b1_ref[...]
    out_ref[...] = out.astype(out_ref.dtype)


def time_embedding(t, freqs, w0, b0, w1, b1, *, block_b=256):
    """t: (B,) timesteps, freqs: (half,), w0: (C_model, C_time) stored (in,out),
    w1: (C_time, C_time).  Returns (B, C_time) f32.  Weights stream as bf16."""
    B = t.shape[0]
    C_model, C_time = w0.shape
    half = C_model // 2

    # Row tiling over B: one full-B block when small, else 256-row tiles
    # (multiple of 8 sublanes) with zero padding.
    if B <= block_b:
        tm, b_pad = B, B
    else:
        tm = block_b
        b_pad = pl.cdiv(B, tm) * tm

    t2d = t.astype(jnp.float32).reshape(B, 1)
    if b_pad != B:
        t2d = jnp.pad(t2d, ((0, b_pad - B), (0, 0)))

    freqs2d = freqs.astype(jnp.float32).reshape(1, half)
    w0_cos = w0[:half].astype(jnp.bfloat16)       # (half, C_time)
    w0_sin = w0[half:].astype(jnp.bfloat16)       # (half, C_time)
    w1_bf16 = w1.astype(jnp.bfloat16)             # (C_time, C_time)
    b0_2d = b0.reshape(1, C_time).astype(jnp.float32)
    b1_2d = b1.reshape(1, C_time).astype(jnp.float32)

    cost = pl.CostEstimate(
        flops=2 * b_pad * C_model * C_time + 2 * b_pad * C_time * C_time,
        transcendentals=b_pad * (C_model + 2 * C_time),
        bytes_accessed=(4 * b_pad + 4 * half
                        + 2 * C_model * C_time + 2 * C_time * C_time
                        + 2 * 4 * C_time + 4 * b_pad * C_time),
    )

    out = pl.pallas_call(
        time_embedding_kernel,
        out_shape=jax.ShapeDtypeStruct((b_pad, C_time), jnp.float32),
        grid=(b_pad // tm,),
        in_specs=[
            pl.BlockSpec((tm, 1), lambda i: (i, 0)),            # t
            pl.BlockSpec((1, half), lambda i: (0, 0)),          # freqs
            pl.BlockSpec((half, C_time), lambda i: (0, 0)),     # w0_cos
            pl.BlockSpec((half, C_time), lambda i: (0, 0)),     # w0_sin
            pl.BlockSpec((1, C_time), lambda i: (0, 0)),        # b0
            pl.BlockSpec((C_time, C_time), lambda i: (0, 0)),   # w1
            pl.BlockSpec((1, C_time), lambda i: (0, 0)),        # b1
        ],
        out_specs=pl.BlockSpec((tm, C_time), lambda i: (i, 0)),
        compiler_params=pltpu.CompilerParams(
            dimension_semantics=("parallel",)),
        cost_estimate=cost,
    )(t2d, freqs2d, w0_cos, w0_sin, b0_2d, w1_bf16, b1_2d)

    return out[:B] if b_pad != B else out


def reference(t, freqs, w0, b0, w1, b1):
    """Pure-JAX reference (matches the PyTorch module's forward)."""
    args = t.astype(jnp.float32)[:, None] * freqs          # (B, half)
    emb = jnp.concatenate([jnp.cos(args), jnp.sin(args)], axis=-1)
    h = emb @ w0 + b0
    h = h * jax.nn.sigmoid(h)
    return h @ w1 + b1


if __name__ == "__main__":
    # Small, TPU-friendly sizes.
    B = 8
    model_channels = 128       # sinusoidal embedding dim
    time_embed_dim = 256

    key = jax.random.PRNGKey(0)
    k_t, k_w0, k_b0, k_w1, k_b1 = jax.random.split(key, 5)

    # Timesteps (B,) — like diffusion step indices.
    t = jax.random.randint(k_t, (B,), 0, 1000).astype(jnp.float32)

    # Sinusoidal frequencies (constant, no parameters).
    half = model_channels // 2
    max_period = 10000.0
    freqs = jnp.exp(-math.log(max_period)
                    * jnp.arange(half, dtype=jnp.float32) / half)

    # Deterministic parameter init. Stored as (in, out) so kernel does x @ W + b.
    scale0 = 1.0 / math.sqrt(model_channels)
    scale1 = 1.0 / math.sqrt(time_embed_dim)
    w0 = jax.random.uniform(k_w0, (model_channels, time_embed_dim),
                            jnp.float32, -scale0, scale0)
    b0 = jax.random.uniform(k_b0, (time_embed_dim,), jnp.float32, -scale0, scale0)
    w1 = jax.random.uniform(k_w1, (time_embed_dim, time_embed_dim),
                            jnp.float32, -scale1, scale1)
    b1 = jax.random.uniform(k_b1, (time_embed_dim,), jnp.float32, -scale1, scale1)

    out = jax.block_until_ready(time_embedding(t, freqs, w0, b0, w1, b1))

    # Reference with the same bf16-rounded weights the kernel streams, so the
    # only remaining error sources are bf16 activation casts + EUP reciprocal.
    w0_q = w0.astype(jnp.bfloat16).astype(jnp.float32)
    w1_q = w1.astype(jnp.bfloat16).astype(jnp.float32)
    ref = reference(t, freqs, w0_q, b0, w1_q, b1)

    assert out.shape == (B, time_embed_dim)
    assert jnp.allclose(out, ref, atol=2e-2, rtol=2e-2), "mismatch vs reference"

    print("KERNEL_OK")
</pallas_src>

<mosaic_0001>
module attributes {stable_mosaic.version = 11 : i64} {
  func.func @time_embedding_kernel(%arg0: i32, %arg1: memref<8x1xf32, #tpu.memory_space<vmem>>, %arg2: memref<1x64xf32, #tpu.memory_space<vmem>>, %arg3: memref<64x256xbf16, #tpu.memory_space<vmem>>, %arg4: memref<64x256xbf16, #tpu.memory_space<vmem>>, %arg5: memref<1x256xf32, #tpu.memory_space<vmem>>, %arg6: memref<256x256xbf16, #tpu.memory_space<vmem>>, %arg7: memref<1x256xf32, #tpu.memory_space<vmem>>, %arg8: memref<8x256xf32, #tpu.memory_space<vmem>>) attributes {dimension_semantics = [#tpu.dimension_semantics<parallel>], iteration_bounds = array<i64: 1>, scalar_prefetch = 0 : i64, scratch_operands = 0 : i64, tpu.core_type = #tpu.core_type<tc>, window_params = [{transform_indices = @transform_0, window_bounds = array<i64: 8, 1>}, {pipeline_mode = #tpu.pipeline_mode<synchronous>, transform_indices = @transform_1, window_bounds = array<i64: 1, 64>}, {pipeline_mode = #tpu.pipeline_mode<synchronous>, transform_indices = @transform_2, window_bounds = array<i64: 64, 256>}, {pipeline_mode = #tpu.pipeline_mode<synchronous>, transform_indices = @transform_3, window_bounds = array<i64: 64, 256>}, {pipeline_mode = #tpu.pipeline_mode<synchronous>, transform_indices = @transform_4, window_bounds = array<i64: 1, 256>}, {pipeline_mode = #tpu.pipeline_mode<synchronous>, transform_indices = @transform_5, window_bounds = array<i64: 256, 256>}, {pipeline_mode = #tpu.pipeline_mode<synchronous>, transform_indices = @transform_6, window_bounds = array<i64: 1, 256>}, {transform_indices = @transform_7, window_bounds = array<i64: 8, 256>}]} {
    %c0 = arith.constant 0 : index
    %c0_0 = arith.constant 0 : index
    %0 = vector.load %arg1[%c0, %c0_0] : memref<8x1xf32, #tpu.memory_space<vmem>>, vector<8x1xf32>
    %c0_1 = arith.constant 0 : index
    %c0_2 = arith.constant 0 : index
    %1 = vector.load %arg2[%c0_1, %c0_2] : memref<1x64xf32, #tpu.memory_space<vmem>>, vector<1x64xf32>
    %2 = vector.broadcast %0 : vector<8x1xf32> to vector<8x64xf32>
    %3 = vector.broadcast %1 : vector<1x64xf32> to vector<8x64xf32>
    %4 = arith.mulf %2, %3 : vector<8x64xf32>
    %5 = math.cos %4 : vector<8x64xf32>
    %6 = arith.truncf %5 : vector<8x64xf32> to vector<8x64xbf16>
    %7 = math.sin %4 : vector<8x64xf32>
    %8 = arith.truncf %7 : vector<8x64xf32> to vector<8x64xbf16>
    %c0_3 = arith.constant 0 : index
    %c0_4 = arith.constant 0 : index
    %9 = vector.load %arg3[%c0_3, %c0_4] : memref<64x256xbf16, #tpu.memory_space<vmem>>, vector<64x256xbf16>
    %cst = arith.constant dense<0.000000e+00> : vector<8x256xf32>
    %10 = tpu.matmul %6, %9, %cst {dimension_numbers = #tpu.dot_dimension_numbers<[1], [0], [0], [1], [0, 0, 1, 1], [], []>} : vector<8x64xbf16>, vector<64x256xbf16>, vector<8x256xf32> -> vector<8x256xf32>
    %c0_5 = arith.constant 0 : index
    %c0_6 = arith.constant 0 : index
    %11 = vector.load %arg4[%c0_5, %c0_6] : memref<64x256xbf16, #tpu.memory_space<vmem>>, vector<64x256xbf16>
    %cst_7 = arith.constant dense<0.000000e+00> : vector<8x256xf32>
    %12 = tpu.matmul %8, %11, %cst_7 {dimension_numbers = #tpu.dot_dimension_numbers<[1], [0], [0], [1], [0, 0, 1, 1], [], []>} : vector<8x64xbf16>, vector<64x256xbf16>, vector<8x256xf32> -> vector<8x256xf32>
    %13 = arith.addf %10, %12 : vector<8x256xf32>
    %c0_8 = arith.constant 0 : index
    %c0_9 = arith.constant 0 : index
    %14 = vector.load %arg5[%c0_8, %c0_9] : memref<1x256xf32, #tpu.memory_space<vmem>>, vector<1x256xf32>
    %15 = vector.broadcast %14 : vector<1x256xf32> to vector<8x256xf32>
    %16 = arith.addf %13, %15 : vector<8x256xf32>
    %cst_10 = arith.constant 0.000000e+00 : f32
    %17 = vector.broadcast %cst_10 : f32 to vector<8x256xf32>
    %18 = arith.subf %17, %16 : vector<8x256xf32>
    %19 = math.exp %18 : vector<8x256xf32>
    %cst_11 = arith.constant 1.000000e+00 : f32
    %20 = vector.broadcast %cst_11 : f32 to vector<8x256xf32>
    %21 = arith.addf %20, %19 : vector<8x256xf32>
    %22 = tpu.reciprocal %21 {approx = true} : vector<8x256xf32> -> vector<8x256xf32>
    %23 = arith.mulf %16, %22 : vector<8x256xf32>
    %24 = arith.truncf %23 : vector<8x256xf32> to vector<8x256xbf16>
    %c0_12 = arith.constant 0 : index
    %c0_13 = arith.constant 0 : index
    %25 = vector.load %arg6[%c0_12, %c0_13] : memref<256x256xbf16, #tpu.memory_space<vmem>>, vector<256x256xbf16>
    %cst_14 = arith.constant dense<0.000000e+00> : vector<8x256xf32>
    %26 = tpu.matmul %24, %25, %cst_14 {dimension_numbers = #tpu.dot_dimension_numbers<[1], [0], [0], [1], [0, 0, 1, 1], [], []>} : vector<8x256xbf16>, vector<256x256xbf16>, vector<8x256xf32> -> vector<8x256xf32>
    %c0_15 = arith.constant 0 : index
    %c0_16 = arith.constant 0 : index
    %27 = vector.load %arg7[%c0_15, %c0_16] : memref<1x256xf32, #tpu.memory_space<vmem>>, vector<1x256xf32>
    %28 = vector.broadcast %27 : vector<1x256xf32> to vector<8x256xf32>
    %29 = arith.addf %26, %28 : vector<8x256xf32>
    %c0_17 = arith.constant 0 : index
    %c0_18 = arith.constant 0 : index
    %30 = vector.load %arg8[%c0_17, %c0_18] : memref<8x256xf32, #tpu.memory_space<vmem>>, vector<8x256xf32>
    tpu.vector_store %arg8[%c0_17, %c0_18], %29 {strides = array<i32>} : memref<8x256xf32, #tpu.memory_space<vmem>>, vector<8x256xf32>,
    return
  }
  func.func @transform_0(%arg0: i32) -> (i32, i32) {
    %c0_i32 = arith.constant 0 : i32
    %c0_i32_0 = arith.constant 0 : i32
    return %arg0, %c0_i32 : i32, i32
  }
  func.func @transform_1(%arg0: i32) -> (i32, i32) {
    %c0_i32 = arith.constant 0 : i32
    %c0_i32_0 = arith.constant 0 : i32
    %c0_i32_1 = arith.constant 0 : i32
    return %c0_i32, %c0_i32_0 : i32, i32
  }
  func.func @transform_2(%arg0: i32) -> (i32, i32) {
    %c0_i32 = arith.constant 0 : i32
    %c0_i32_0 = arith.constant 0 : i32
    %c0_i32_1 = arith.constant 0 : i32
    return %c0_i32, %c0_i32_0 : i32, i32
  }
  func.func @transform_3(%arg0: i32) -> (i32, i32) {
    %c0_i32 = arith.constant 0 : i32
    %c0_i32_0 = arith.constant 0 : i32
    %c0_i32_1 = arith.constant 0 : i32
    return %c0_i32, %c0_i32_0 : i32, i32
  }
  func.func @transform_4(%arg0: i32) -> (i32, i32) {
    %c0_i32 = arith.constant 0 : i32
    %c0_i32_0 = arith.constant 0 : i32
    %c0_i32_1 = arith.constant 0 : i32
    return %c0_i32, %c0_i32_0 : i32, i32
  }
  func.func @transform_5(%arg0: i32) -> (i32, i32) {
    %c0_i32 = arith.constant 0 : i32
    %c0_i32_0 = arith.constant 0 : i32
    %c0_i32_1 = arith.constant 0 : i32
    return %c0_i32, %c0_i32_0 : i32, i32
  }
  func.func @transform_6(%arg0: i32) -> (i32, i32) {
    %c0_i32 = arith.constant 0 : i32
    %c0_i32_0 = arith.constant 0 : i32
    %c0_i32_1 = arith.constant 0 : i32
    return %c0_i32, %c0_i32_0 : i32, i32
  }
  func.func @transform_7(%arg0: i32) -> (i32, i32) {
    %c0_i32 = arith.constant 0 : i32
    %c0_i32_0 = arith.constant 0 : i32
    return %arg0, %c0_i32 : i32, i32
  }
}

</mosaic_0001>

<bundles_post_ra>
// kernel: tpu_custom_call.1
= control target key start
LH: loop header
LB: loop body
LE: loop exit
PB: predicated region body
PF: predicated region fallthrough
CT: control target
= control target key end

     0   :  { %12 = vsyncpa [#allocation3], 0  ;;  %s1182_s0 = inlined_call_operand.vmem [shape: f32[8,1], index: 0, kind: input, shape index: {}]   ;;  %s1183_s1 = inlined_call_operand.vmem [shape: f32[1,64], index: 1, kind: input, shape index: {}]   ;;  %s1184_s2 = inlined_call_operand.hbm [shape: bf16[64,256], index: 2, kind: input, shape index: {}]   ;;  %s1185_s3 = inlined_call_operand.hbm [shape: bf16[64,256], index: 3, kind: input, shape index: {}]   ;;  %s1186_s4 = inlined_call_operand.vmem [shape: f32[1,256], index: 4, kind: input, shape index: {}]   ;;  %s1187_s5 = inlined_call_operand.hbm [shape: bf16[256,256], index: 5, kind: input, shape index: {}]   ;;  %s1188_s6 = inlined_call_operand.vmem [shape: f32[1,256], index: 6, kind: input, shape index: {}]   ;;  %s1189_s7 = inlined_call_operand.hbm [shape: f32[8,256], index: 7, kind: output, shape index: {}]  }
   0x1   :  { %13 = vsyncpa [#allocation6], 0 }
   0x2   :  { %14 = vsyncpa [#allocation4], 0  ;;  %s1023_s24 = smov [#allocation5]   ;;  %s1024_s26 = smov [#allocation2]  }
   0x3   :  { %s36_s25 = sshll.u32 %s1023_s24, 4  ;;  %s24_s27 = sshll.u32 %s1024_s26, 4  ;;  %s37_s25 = int_to_ptr.vmem [resolvable:$true] %s36_s25  ;;  %s1076_s27 = int_to_ptr.vmem [resolvable:$true] %s24_s27 }
   0x4   :  { %s929_s30 = scalar_lea.hbm %s1185_s3, 1024 }
   0x5   :  { %p930_p0 = scmp.ne.s32.totalorder %s1185_s3, %s929_s30  ;;  %p933_p1 = scmp.lt.u32.totalorder %s929_s30, %s1185_s3 }
   0x7   :  { %p935_p2 = pnand %p933_p1, %p930_p0 }
   0x9   :  { %938 = shalt.err (!%p935_p2)
}
   0xa   :  { %s939_s12 = scalar_lea.vmem %s37_s25, 1024  ;;  %p944_p4 = scmp.lt.s32.totalorder %s37_s25, %s37_s25 }
   0xb   :  { %p940_p3 = scmp.ne.s32.totalorder %s37_s25, %s939_s12  ;;  %p945_p5 = scmp.lt.s32.totalorder %s939_s12, %s939_s12 }
   0xd   :  { %p946_p6 = por %p945_p5, %p944_p4 }
   0xf   :  { %p947_p7 = pnand %p946_p6, %p940_p3 }
  0x11   :  { %950 = shalt.err (!%p947_p7)
}
  0x12   :  { %s1025_s13 = smov 128   ;;  %s1026_s14 = smov 8  }
  0x13   :  { %42 = dma.hbm_to_vmem [thread:$0]  %s1185_s3, 1024, %s37_s25, [#allocation6], %s1025_s13, %s1025_s13, %s1026_s14  }
  0x14   :  { %s951_s19 = scalar_lea.hbm %s1184_s2, 1024 }
  0x15   :  { %p952_p8 = scmp.ne.s32.totalorder %s1184_s2, %s951_s19  ;;  %p955_p9 = scmp.lt.u32.totalorder %s951_s19, %s1184_s2 }
  0x17   :  { %p957_p10 = pnand %p955_p9, %p952_p8 }
  0x19   :  { %960 = shalt.err (!%p957_p10)
}
  0x1a   :  { %s961_s24 = scalar_lea.vmem %s1076_s27, 1024  ;;  %p966_p12 = scmp.lt.s32.totalorder %s1076_s27, %s1076_s27 }
  0x1b   :  { %p962_p11 = scmp.ne.s32.totalorder %s1076_s27, %s961_s24  ;;  %p967_p13 = scmp.lt.s32.totalorder %s961_s24, %s961_s24 }
  0x1d   :  { %p968_p0 = por %p967_p13, %p966_p12 }
  0x1f   :  { %p969_p1 = pnand %p968_p0, %p962_p11 }
  0x21   :  { %972 = shalt.err (!%p969_p1)
}
  0x22   :  { %30 = dma.hbm_to_vmem [thread:$0]  %s1184_s2, 1024, %s1076_s27, [#allocation3], %s1025_s13, %s1025_s13, %s1026_s14  }
  0x23   :  { %s1027_s26 = smov [#allocation7]   ;;  %s973_s8 = scalar_lea.hbm %s1187_s5, 4096 }
  0x24   :  { %s50_s28 = sshll.u32 %s1027_s26, 4  ;;  %p974_p2 = scmp.ne.s32.totalorder %s1187_s5, %s973_s8  ;;  %s51_s28 = int_to_ptr.vmem [resolvable:$true] %s50_s28 }
  0x25   :  { %p977_p3 = scmp.lt.u32.totalorder %s973_s8, %s1187_s5 }
  0x27   :  { %p979_p4 = pnand %p977_p3, %p974_p2 }
  0x29   :  { %982 = shalt.err (!%p979_p4)
}
  0x2a   :  { %s983_s15 = scalar_lea.vmem %s51_s28, 4096  ;;  %p988_p6 = scmp.lt.s32.totalorder %s51_s28, %s51_s28 }
  0x2b   :  { %p984_p5 = scmp.ne.s32.totalorder %s51_s28, %s983_s15  ;;  %p989_p7 = scmp.lt.s32.totalorder %s983_s15, %s983_s15 }
  0x2d   :  { %p990_p8 = por %p989_p7, %p988_p6 }
  0x2f   :  { %p991_p9 = pnand %p990_p8, %p984_p5 }
  0x31   :  { %994 = shalt.err (!%p991_p9)
}
  0x32   :  { %56 = dma.hbm_to_vmem [thread:$0]  %s1187_s5, 4096, %s51_s28, [#allocation6], %s1025_s13, %s1025_s13, %s1026_s14  }
  0x33   :  { %1017 = dma.done.wait [#allocation3], 1024  }
  0x34   :  { %1018 = vsyncadd [#allocation3], 4294966272 }
  0x35   :  { %1019 = dma.done.wait [#allocation6], 5120  }
  0x36   :  { %1020 = vsyncadd [#allocation6], 4294962176  ;;  %v1028_v0 = vmov 0   ;;  %v69_v1 = vld [vmem:[%s1182_s0] sm:$0xff]  ;;  %v848_v4 = vld [vmem:[#allocation5 + $0x14] ss:$8 sps:$4 sm:$0xff]  }
  0x37   :  { %844 = vset.pattern.permute.xlu0 %v1028_v0  ;;  %384 = vmatprep.mubr.bf16.mxu1 %v1028_v0  ;;  %v845_v2 = vld [vmem:[#allocation5 + $0x4] ss:$8 sps:$4 sm:$0xff]   ;;  %v847_v3 = vld [vmem:[#allocation5] ss:$8 sps:$4 sm:$0xff]   ;;  %v850_v5 = vld [vmem:[#allocation5 + $0x10] ss:$8 sps:$4 sm:$0xff]  }
  0x38   :  { %73 = vperm.xlu0 %844, %v69_v1   ;;  %352 = vmatprep.subr.bf16.mxu1 %v845_v2  ;;  %v851_v6 = vld [vmem:[#allocation5 + $0x24] ss:$8 sps:$4 sm:$0xff]   ;;  %v853_v7 = vld [vmem:[#allocation5 + $0x20] ss:$8 sps:$4 sm:$0xff]   ;;  %v854_v8 = vld [vmem:[#allocation5 + $0x34] ss:$8 sps:$4 sm:$0xff]  }
  0x39   :  { %353 = vmatpush1.bf16.msra.mxu1 %v847_v3  ;;  %v856_v9 = vld [vmem:[#allocation5 + $0x30] ss:$8 sps:$4 sm:$0xff]   ;;  %v859_v10 = vld [vmem:[#allocation2 + $0x4] ss:$8 sps:$4 sm:$0xff]   ;;  %v871_v12 = vld [vmem:[#allocation7] ss:$8 sps:$4 sm:$0xff]  }
  0x3a   :  { %354 = vmatprep.subr.bf16.mxu1 %v848_v4  ;;  %v869_v11 = vld [vmem:[#allocation7 + $0x4] ss:$8 sps:$4 sm:$0xff]   ;;  %v872_v13 = vld [vmem:[#allocation7 + $0x14] ss:$8 sps:$4 sm:$0xff]   ;;  %v874_v14 = vld [vmem:[#allocation7 + $0x10] ss:$8 sps:$4 sm:$0xff]  }
  0x3b   :  { %709 = vmatprep.subr.bf16.mxu0 %v869_v11  ;;  %v875_v15 = vld [vmem:[#allocation7 + $0x24] ss:$8 sps:$4 sm:$0xff]   ;;  %v877_v16 = vld [vmem:[#allocation7 + $0x20] ss:$8 sps:$4 sm:$0xff]   ;;  %v1029_v30 = vmov 683565275  }
  0x3c   :  { %710 = vmatpush1.bf16.msra.mxu0 %v871_v12  ;;  %v768_v17 = vld [vmem:[%s1183_s1] ss:$0 sm:$0xff]  ;;  %v1030_v32 = vmov 2475754826   ;;  %v1031_v35 = vmov 2131351028  }
  0x3d   :  { %355 = vmatpush1.bf16.msra.mxu1 %v850_v5  ;;  %711 = vmatprep.subr.bf16.mxu0 %v872_v13  ;;  %v1032_v38 = vmov 2102212464   ;;  %v1033_v41 = vmov 920167782   ;;  %v1034_v44 = vmov 1326507024  }
  0x3e   :  { %356 = vmatprep.subr.bf16.mxu1 %v851_v6  ;;  %vm348_vm13 = vcmask 523264   ;;  %s1035_s18 = smov [#allocation8]  }
  0x3f   :  { %s758_s19 = sshll.u32 %s1035_s18, 4  ;;  %s759_s19 = int_to_ptr.vmem [resolvable:$true] %s758_s19 }
  0x40   :  { %712 = vmatpush1.bf16.msra.mxu0 %v874_v14  ;;  %s995_s20 = scalar_lea.vmem %s759_s19, 256  ;;  %p1000_p11 = scmp.lt.s32.totalorder %s759_s19, %s759_s19 }
  0x41   :  { %357 = vmatpush1.bf16.msra.mxu1 %v853_v7  ;;  %713 = vmatprep.subr.bf16.mxu0 %v875_v15  ;;  %p996_p10 = scmp.ne.s32.totalorder %s759_s19, %s995_s20  ;;  %p1001_p12 = scmp.lt.s32.totalorder %s995_s20, %s995_s20 }
  0x42   :  { %358 = vmatprep.subr.bf16.mxu1 %v854_v8 }
  0x43   :  { %p1002_p13 = por %p1001_p12, %p1000_p11 }
  0x44   :  { %714 = vmatpush1.bf16.msra.mxu0 %v877_v16 }
  0x45   :  { %359 = vmatpush1.bf16.msra.mxu1 %v856_v9  ;;  %p1003_p0 = pnand %p1002_p13, %p996_p10 }
  0x46   :  { %436 = vmatprep.subr.bf16.mxu1 %v859_v10 }
  0xb7   :  { %v74_v18 = vpop.permute.xlu0 %73 }
  0xb8   :  { %v1136_v19 = vmul.f32 %v768_v17, %v74_v18 }
  0xba   :  { %v86_v20 = vand.u32 2139095040, %v1136_v19  ;;  %v83_v24 = vand.u32 2147483647, %v1136_v19  ;;  %vm85_vm7 = vcmp.lt.s32.totalorder %v1136_v19, 0  ;;  %vm175_vm12 = vweird.f32 %v1136_v19 }
  0xbc   :  { %v87_v21 = vshrl.u32 %v86_v20, 23  ;;  %v90_v27 = vand.u32 8388607, %v83_v24  ;;  %vm84_vm8 = vcmp.le.f32.partialorder %v83_v24, 0.7853982 }
  0xbe   :  { %v769_v22 = vadd.s32 4294967169, %v87_v21  ;;  %v91_v46 = vor.u32 8388608, %v90_v27 }
  0xc0   :  { %v93_v23 = vadd.s32 1, %v769_v22  ;;  %v131_v60 = vshll.u32 %v91_v46, 8 }
  0xc2   :  { %vm94_vm0 = vcmp.gt.s32.totalorder %v93_v23, 0 }
  0xc3   :  { %v95_v25 = vsel %vm94_vm0, %v93_v23, 0 }
  0xc4   :  { %v97_v26 = vand.u32 31, %v95_v25  ;;  %v96_v29 = vshrl.u32 %v95_v25, 5 }
  0xc6   :  { %v98_v28 = vsub.s32 32, %v97_v26  ;;  %v100_v31 = vshll.u32 %v1029_v30, %v97_v26  ;;  %v103_v33 = vshll.u32 %v1030_v32, %v97_v26  ;;  %v106_v37 = vshll.u32 %v1031_v35, %v97_v26 }
  0xc7   :  { %v109_v40 = vshll.u32 %v1032_v38, %v97_v26  ;;  %v112_v43 = vshll.u32 %v1033_v41, %v97_v26  ;;  %vm115_vm1 = vcmp.lt.s32.totalorder %v96_v29, 1  ;;  %vm118_vm2 = vcmp.lt.s32.totalorder %v96_v29, 4 }
  0xc8   :  { %v101_v34 = vshrl.u32 %v1030_v32, %v98_v28  ;;  %v104_v36 = vshrl.u32 %v1031_v35, %v98_v28  ;;  %v107_v39 = vshrl.u32 %v1032_v38, %v98_v28  ;;  %v110_v42 = vshrl.u32 %v1033_v41, %v98_v28 }
  0xc9   :  { %v113_v45 = vshrl.u32 %v1034_v44, %v98_v28  ;;  %v99_v55 = vshrl.u32 %v1029_v30, %v98_v28  ;;  %vm117_vm3 = vcmp.lt.s32.totalorder %v96_v29, 3  ;;  %vm116_vm4 = vcmp.lt.s32.totalorder %v96_v29, 2 }
  0xca   :  { %v102_v47 = vor.u32 %v101_v34, %v100_v31  ;;  %v105_v48 = vor.u32 %v104_v36, %v103_v33  ;;  %v108_v49 = vor.u32 %v107_v39, %v106_v37  ;;  %v111_v50 = vor.u32 %v110_v42, %v109_v40 }
  0xcb   :  { %v114_v51 = vor.u32 %v113_v45, %v112_v43 }
  0xcc   :  { %v120_v52 = vsel %vm118_vm2, %v108_v49, 2102212464  ;;  %v123_v53 = vsel %vm115_vm1, %v102_v47, %v105_v48  ;;  %v127_v54 = vsel %vm115_vm1, %v105_v48, %v108_v49  ;;  %v124_v56 = vsel %vm118_vm2, %v111_v50, 920167782 }
  0xcd   :  { %v128_v57 = vsel %vm118_vm2, %v114_v51, 1326507024  ;;  %v125_v58 = vsel %vm117_vm3, %v108_v49, %v124_v56  ;;  %v119_v61 = vsel %vm115_vm1, %v99_v55, %v102_v47  ;;  %v121_v62 = vsel %vm117_vm3, %v105_v48, %v120_v52  ;;  %v857_v48 = vld [vmem:[#allocation2] ss:$8 sps:$4 sm:$0xff]   ;;  %v862_v51 = vld [vmem:[#allocation2 + $0x14] ss:$8 sps:$4 sm:$0xff]  }
  0xce   :  { %v129_v59 = vsel %vm117_vm3, %v111_v50, %v128_v57  ;;  %v126_v63 = vsel %vm116_vm4, %v123_v53, %v125_v58  ;;  %v122_v6 = vsel %vm116_vm4, %v119_v61, %v121_v62  ;;  %v860_v53 = vld [vmem:[#allocation2 + $0x10] ss:$8 sps:$4 sm:$0xff]   ;;  %v863_v57 = vld [vmem:[#allocation2 + $0x20] ss:$8 sps:$4 sm:$0xff]   ;;  %v868_v58 = vld [vmem:[#allocation2 + $0x34] ss:$8 sps:$4 sm:$0xff]  }
  0xcf   :  { %v130_v1 = vsel %vm116_vm4, %v127_v54, %v129_v59  ;;  %v1145_v4 = vmul.u32.u64.low %v131_v60, %v126_v63  ;;  %v1146_v5 = vmul.u32.u64.high %v131_v60, %v126_v63, %v1145_v4  ;;  %v138_v8 = vmul.u32 %v131_v60, %v122_v6  ;;  %v865_v54 = vld [vmem:[#allocation2 + $0x24] ss:$8 sps:$4 sm:$0xff]   ;;  %v878_v62 = vld [vmem:[#allocation7 + $0x34] ss:$8 sps:$4 sm:$0xff]   ;;  %v880_v63 = vld [vmem:[#allocation7 + $0x30] ss:$8 sps:$4 sm:$0xff]  }
  0xd0   :  { %v1142_v2 = vmul.u32.u64.low %v131_v60, %v130_v1  ;;  %v1143_v3 = vmul.u32.u64.high %v131_v60, %v130_v1, %v1142_v2  ;;  %v866_v60 = vld [vmem:[#allocation2 + $0x30] ss:$8 sps:$4 sm:$0xff]   ;;  %715 = vmatprep.subr.bf16.mxu0 %v878_v62  ;;  %v881_v1 = vld [vmem:[#allocation7 + $0x44] ss:$8 sps:$4 sm:$0xff]   ;;  %v890_v6 = vld [vmem:[#allocation7 + $0x74] ss:$8 sps:$4 sm:$0xff]  }
  0xd1   :  { %v141_v7 = vadd.s32 1, %v1146_v5  ;;  %716 = vmatpush1.bf16.msra.mxu0 %v880_v63  ;;  %v883_v2 = vld [vmem:[#allocation7 + $0x40] ss:$8 sps:$4 sm:$0xff]  }
  0xd2   :  { %vm140_vm5 = vc.u32 %v1143_v3, %v1145_v4  ;;  %v139_v21 = vadd.s32 %v1145_v4, %v1143_v3  ;;  %717 = vmatprep.subr.bf16.mxu0 %v881_v1  ;;  %v884_v3 = vld [vmem:[#allocation7 + $0x54] ss:$8 sps:$4 sm:$0xff]   ;;  %v886_v4 = vld [vmem:[#allocation7 + $0x50] ss:$8 sps:$4 sm:$0xff]  }
  0xd3   :  { %v142_v9 = vsel %vm140_vm5, %v141_v7, %v1146_v5  ;;  %v887_v5 = vld [vmem:[#allocation7 + $0x64] ss:$8 sps:$4 sm:$0xff]   ;;  %v892_v7 = vld [vmem:[#allocation7 + $0x70] ss:$8 sps:$4 sm:$0xff]  }
  0xd4   :  { %v143_v10 = vadd.s32 %v142_v9, %v138_v8  ;;  %v893_v8 = vld [vmem:[#allocation7 + $0x84] ss:$8 sps:$4 sm:$0xff]   ;;  %v895_v9 = vld [vmem:[#allocation7 + $0x80] ss:$8 sps:$4 sm:$0xff]  }
  0xd5   :  { %718 = vmatpush1.bf16.msra.mxu0 %v883_v2 }
  0xd6   :  { %v144_v11 = vadd.s32 536870912, %v143_v10  ;;  %719 = vmatprep.subr.bf16.mxu0 %v884_v3 }
  0xd8   :  { %v145_v12 = vshrl.u32 %v144_v11, 30  ;;  %v898_v11 = vld [vmem:[#allocation7 + $0x90] ss:$8 sps:$4 sm:$0xff]  }
  0xd9   :  { %720 = vmatpush1.bf16.msra.mxu0 %v886_v4 }
  0xda   :  { %v146_v13 = vshll.u32 %v145_v12, 30  ;;  %v169_v34 = vsub.s32 4, %v145_v12  ;;  %721 = vmatprep.subr.bf16.mxu0 %v887_v5 }
  0xdc   :  { %v147_v14 = vsub.s32 %v143_v10, %v146_v13  ;;  %v170_v37 = vsel %vm85_vm7, %v169_v34, %v145_v12  ;;  %v896_v10 = vld [vmem:[#allocation7 + $0x94] ss:$8 sps:$4 sm:$0xff]   ;;  %v899_v12 = vld [vmem:[#allocation7 + $0xa4] ss:$8 sps:$4 sm:$0xff]   ;;  %v901_v13 = vld [vmem:[#allocation7 + $0xa0] ss:$8 sps:$4 sm:$0xff]  }
  0xdd   :  { %v172_v39 = vsel %vm84_vm8, 0, %v170_v37 }
  0xde   :  { %v149_v15 = vsub.s32 0, %v147_v14  ;;  %v280_v40 = vadd.s32 3, %v172_v39  ;;  %v176_v52 = vand.u32 3, %v172_v39 }
  0xe0   :  { %v770_v16 = vmin.u32 %v149_v15, %v147_v14  ;;  %v281_v41 = vand.u32 3, %v280_v40  ;;  %vm178_vm14 = vcmp.eq.s32.totalorder %v176_v52, 0  ;;  %vm181_vm15 = vcmp.eq.s32.totalorder %v176_v52, 2  ;;  %v904_v15 = vld [vmem:[#allocation7 + $0xb0] ss:$8 sps:$4 sm:$0xff]  }
  0xe1   :  { %vm177_vm0 = vcmp.lt.s32.totalorder %v176_v52, 2 }
  0xe2   :  { %v151_v17 = vclz %v770_v16  ;;  %vm286_vm9 = vcmp.eq.s32.totalorder %v281_v41, 2  ;;  %vm283_vm10 = vcmp.eq.s32.totalorder %v281_v41, 0  ;;  %vm282_vm11 = vcmp.lt.s32.totalorder %v281_v41, 2  ;;  %v905_v16 = vld [vmem:[#allocation7 + $0xc4] ss:$8 sps:$4 sm:$0xff]  }
  0xe4   :  { %v771_v18 = vadd.s32 4294967294, %v151_v17  ;;  %v907_v17 = vld [vmem:[#allocation7 + $0xc0] ss:$8 sps:$4 sm:$0xff]  }
  0xe6   :  { %vm772_vm6 = vcmp.lt.s32.totalorder %v771_v18, 0 }
  0xe7   :  { %v154_v20 = vsel %vm772_vm6, 0, %v771_v18  ;;  %v908_v18 = vld [vmem:[#allocation7 + $0xd4] ss:$8 sps:$4 sm:$0xff]  }
  0xe8   :  { %v155_v22 = vsub.s32 32, %v154_v20  ;;  %v159_v23 = vsub.s32 4294967266, %v154_v20  ;;  %v156_v25 = vshll.u32 %v147_v14, %v154_v20  ;;  %v902_v14 = vld [vmem:[#allocation7 + $0xb4] ss:$8 sps:$4 sm:$0xff]   ;;  %v910_v20 = vld [vmem:[#allocation7 + $0xd0] ss:$8 sps:$4 sm:$0xff]  }
  0xea   :  { %v157_v26 = vshrl.u32 %v139_v21, %v155_v22  ;;  %v160_v27 = vadd.s32 127, %v159_v23  ;;  %v911_v21 = vld [vmem:[#allocation7 + $0xe4] ss:$8 sps:$4 sm:$0xff]   ;;  %v913_v22 = vld [vmem:[#allocation7 + $0xe0] ss:$8 sps:$4 sm:$0xff]  }
  0xeb   :  { %v914_v23 = vld [vmem:[#allocation7 + $0xf4] ss:$8 sps:$4 sm:$0xff]  }
  0xec   :  { %v158_v28 = vor.u32 %v157_v26, %v156_v25  ;;  %v161_v29 = vshll.u32 %v160_v27, 23  ;;  %v916_v25 = vld [vmem:[#allocation7 + $0xf0] ss:$8 sps:$4 sm:$0xff]  }
  0xee   :  { %v162_v30 = vor.u32 4788187, %v161_v29  ;;  %v165_v32 = vcvt.s32.f32 %v158_v28 }
  0xf0   :  { %v163_v31 = vand.u32 2147483647, %v162_v30  ;;  %v479_v30 = vlaneseq }
  0xf2   :  { %v166_v33 = vmul.f32 %v165_v32, %v163_v31  ;;  %v480_v31 = vshrl.u32 %v479_v30, 7 }
  0xf4   :  { %v167_v35 = vxor.u32 2147483648, %v166_v33  ;;  %v481_v32 = vsub.s32 0, %v480_v31  ;;  %v485_v34 = vsub.s32 1, %v480_v31 }
  0xf6   :  { %v168_v36 = vsel %vm85_vm7, %v167_v35, %v166_v33  ;;  %v477_v33 = vld [vmem:[%s1186_s4] sm:$0x3] }
  0xf7   :  { %v171_v38 = vsel %vm84_vm8, %v1136_v19, %v168_v36  ;;  %v889_v19 = vld [vmem:[#allocation7 + $0x60] ss:$8 sps:$4 sm:$0xff]   ;;  %v482_v35 = vrot.slane %v477_v33, %v481_v32  ;;  %v486_v37 = vrot.slane %v477_v33, %v485_v34 }
  0xf8   :  { %917 = vcosq.f32 %v171_v38  ;;  %722 = vmatpush1.bf16.msra.mxu0 %v889_v19 }
  0xf9   :  { %919 = vsinq.f32 %v171_v38  ;;  %723 = vmatprep.subr.bf16.mxu0 %v890_v6 }
  0xfc   :  { %724 = vmatpush1.bf16.msra.mxu0 %v892_v7 }
  0xfd   :  { %725 = vmatprep.subr.bf16.mxu0 %v893_v8 }
 0x100   :  { %726 = vmatpush1.bf16.msra.mxu0 %v895_v9 }
 0x101   :  { %727 = vmatprep.subr.bf16.mxu0 %v896_v10 }
 0x102   :  { %v918_v42 = vpop.eup %917 }
 0x103   :  { %v920_v43 = vpop.eup %919  ;;  %v182_v44 = vxor.u32 2147483648, %v918_v42 }
 0x104   :  { %v179_v45 = vxor.u32 2147483648, %v920_v43  ;;  %728 = vmatpush1.bf16.msra.mxu0 %v898_v11 }
 0x105   :  { %v288_v46 = vsel %vm286_vm9, %v182_v44, %v920_v43  ;;  %v183_v56 = vsel %vm181_vm15, %v182_v44, %v920_v43  ;;  %729 = vmatprep.subr.bf16.mxu0 %v899_v12 }
 0x106   :  { %v285_v47 = vsel %vm283_vm10, %v918_v42, %v179_v45  ;;  %v180_v55 = vsel %vm178_vm14, %v918_v42, %v179_v45 }
 0x107   :  { %v289_v24 = vsel %vm282_vm11, %v285_v47, %v288_v46  ;;  %v184_v59 = vsel %vm177_vm0, %v180_v55, %v183_v56 }
 0x108   :  { %v290_v49 = vsel %vm175_vm12, nan, %v289_v24  ;;  %v185_v61 = vsel %vm175_vm12, nan, %v184_v59  ;;  %730 = vmatpush1.bf16.msra.mxu0 %v901_v13 }
 0x109   :  { %v291_v50 = vpack.c.bf16 %v290_v49, %v290_v49  ;;  %731 = vmatprep.subr.bf16.mxu0 %v902_v14 }
 0x10b   :  { %785 = vmatmul.mubr.msk.bf16.vlgmr.msra.gmra.mrb[0].mxu1 %vm348_vm13, %v291_v50 }
 0x10c   :  { %437 = vmatpush1.bf16.msra.mxu1 %v857_v48  ;;  %468 = vmatprep.mubr.bf16.mxu1 %v1028_v0  ;;  %v186_v0 = vpack.c.bf16 %v185_v61, %v185_v61 }
 0x10d   :  { %438 = vmatprep.subr.bf16.mxu1 %v862_v51  ;;  %732 = vmatpush1.bf16.msra.mxu0 %v904_v15 }
 0x10e   :  { %733 = vmatprep.subr.bf16.mxu0 %v905_v16 }
 0x110   :  { %439 = vmatpush1.bf16.msra.mxu1 %v860_v53 }
 0x111   :  { %440 = vmatprep.subr.bf16.mxu1 %v865_v54  ;;  %734 = vmatpush1.bf16.msra.mxu0 %v907_v17 }
 0x112   :  { %735 = vmatprep.subr.bf16.mxu0 %v908_v18 }
 0x114   :  { %441 = vmatpush1.bf16.msra.mxu1 %v863_v57 }
 0x115   :  { %442 = vmatprep.subr.bf16.mxu1 %v868_v58  ;;  %736 = vmatpush1.bf16.msra.mxu0 %v910_v20  ;;  %v537_v58 = vld [vmem:[%s1188_s6] sm:$0x3] }
 0x116   :  { %737 = vmatprep.subr.bf16.mxu0 %v911_v21  ;;  %v542_v59 = vrot.slane %v537_v58, %v481_v32 }
 0x118   :  { %443 = vmatpush1.bf16.msra.mxu1 %v866_v60  ;;  %v546_v60 = vrot.slane %v537_v58, %v485_v34 }
 0x119   :  { %738 = vmatpush1.bf16.msra.mxu0 %v913_v22 }
 0x11a   :  { %739 = vmatprep.subr.bf16.mxu0 %v914_v23 }
 0x11b   :  { %794 = vmatmul.mubr.msk.bf16.vlgmr.msra.gmra.mrb[4].mxu1 %vm348_vm13, %v186_v0 }
 0x11d   :  { %740 = vmatpush1.bf16.msra.mxu0 %v916_v25 }
 0x1de   :  { %v386_v26 = vpop.f32.mrb[0].mxu1 }
 0x1df   :  { %v388_v27 = vpop.f32.mrb[1].mxu1 }
 0x1e0   :  { %v390_v28 = vpop.f32.mrb[2].mxu1 }
 0x1e1   :  { %v391_v29 = vpop.f32.mrb[3].mxu1 }
 0x1ee   :  { %v470_v36 = vpop.f32.mrb[4].mxu1 }
 0x1ef   :  { %v471_v38 = vadd.f32 %v470_v36, %v386_v26  ;;  %v472_v39 = vpop.f32.mrb[5].mxu1 }
 0x1f0   :  { %v473_v40 = vadd.f32 %v472_v39, %v388_v27  ;;  %v474_v41 = vpop.f32.mrb[6].mxu1 }
 0x1f1   :  { %v489_v42 = vadd.f32 %v482_v35, %v471_v38  ;;  %v475_v43 = vpop.f32.mrb[7].mxu1 }
 0x1f2   :  { %v490_v44 = vadd.f32 %v486_v37, %v473_v40 }
 0x1f3   :  { %v491_v45 = vsub.f32 0.0, %v489_v42 }
 0x1f4   :  { %v492_v46 = vsub.f32 0.0, %v490_v44 }
 0x1f5   :  { %v493_v47 = vmul.f32 1.442695, %v491_v45 }
 0x1f6   :  { %v495_v24 = vmul.f32 1.442695, %v492_v46 }
 0x1f7   :  { %921 = vpow2.f32 %v493_v47 }
 0x1f8   :  { %923 = vpow2.f32 %v495_v24 }
 0x201   :  { %v922_v48 = vpop.eup %921 }
 0x202   :  { %v924_v49 = vpop.eup %923  ;;  %v497_v50 = vadd.f32 1.0, %v922_v48 }
 0x203   :  { %v498_v51 = vadd.f32 1.0, %v924_v49 }
 0x204   :  { %925 = vrcp.f32 %v497_v50 }
 0x205   :  { %927 = vrcp.f32 %v498_v51 }
 0x20e   :  { %v926_v52 = vpop.eup %925 }
 0x20f   :  { %v928_v53 = vpop.eup %927  ;;  %v501_v54 = vmul.f32 %v926_v52, %v489_v42 }
 0x210   :  { %v502_v55 = vmul.f32 %v928_v53, %v490_v44 }
 0x211   :  { %v503_v57 = vpack.c.bf16 %v501_v54, %v501_v54 }
 0x212   :  { %v504_v56 = vpack.c.bf16 %v502_v55, %v502_v55 }
 0x214   :  { %741 = vmatprep.mubr.bf16.mxu0 %v504_v56 }
 0x215   :  { %742 = vmatmul.mubr.bf16.vlgmr.msra.gmra.mrb[0].mxu0 %v503_v57 }
 0x2e8   :  { %v743_v61 = vpop.f32.mrb[0].mxu0 }
 0x2e9   :  { %v744_v0 = vadd.f32 %v743_v61, %v542_v59  ;;  %v745_v62 = vpop.f32.mrb[1].mxu0 }
 0x2ea   :  { %v746_v63 = vadd.f32 %v745_v62, %v546_v60  ;;  %v747_v1 = vpop.f32.mrb[2].mxu0 }
 0x2eb   :  { %750 = vst [vmem:[#allocation8] sm:$0xff] %v744_v0  ;;  %v748_v2 = vpop.f32.mrb[3].mxu0 }
 0x2ec   :  { %751 = vst [vmem:[#allocation8 + $0x8] sm:$0xff] %v746_v63 }
 0x2ed   :  { %1006 = shalt.err (!%p1003_p0)
}
 0x2ee   :  { %s1007_s22 = scalar_lea.hbm %s1189_s7, 256 }
 0x2ef   :  { %p1008_p1 = scmp.ne.s32.totalorder %s1189_s7, %s1007_s22  ;;  %p1011_p2 = scmp.lt.u32.totalorder %s1007_s22, %s1189_s7 }
 0x2f1   :  { %p1013_p3 = pnand %p1011_p2, %p1008_p1 }
 0x2f3   :  { %1016 = shalt.err (!%p1013_p3)
}
 0x2f4   :  { %761 = dma.vmem_to_hbm [thread:$0]  %s759_s19, 256, %s1189_s7, [#allocation4]  }
 0x2f5   :  { %1021 = dma.done.wait [#allocation4], 256  }
 0x2f6   :  { %1022 = vsyncadd [#allocation4], 4294967040 }
 0x2f7   :  { %765 = vsyncpa [#allocation3], 1 }
 0x2f8   :  { %766 = vsyncpa [#allocation6], 1 }
 0x2f9   :  { %767 = vsyncpa [#allocation4], 1 }

</bundles_post_ra>
